<compile_context>
chip_gen: v5e
topology: v5e:2x2
jax: 0.10.0
libtpu: 0.0.40
codegen_flags: <defaults>
</compile_context>

<pallas_src>
import jax
import jax.numpy as jnp
from jax import lax
from jax.experimental import pallas as pl
from jax.experimental.pallas import tpu as pltpu

# ----------------------------- configuration (small synthetic "tokenizer") ------
VOCAB = 20          # tokenizer.input_dict_len
EMBED = 16          # tokenizer.input_embed_dim
HIDDEN = 32         # tokenizer.input_hidden_size
PAD_IDX = 0         # tokenizer.input_word2idx['<PAD>']
T = 8               # max sequence length
B = 2               # batch size


# ----------------------------- Pallas kernel ------------------------------------
def gru_kernel(tok_ref, len_ref, g_ref, whh_ref, bhn_ref, out_ref, hn_ref):
    """Single invocation: full GRU recurrence over T steps (fully unrolled)."""
    Tl, Bp, H = out_ref.shape
    Vp = g_ref.shape[0]

    # ---- prologue (off the serial chain) ---------------------------------------
    # Fused embedding + input projection + folded r/z biases:
    #   gi[t*Bp+b] = embed[tok[t,b]] @ [Wir|Wiz|Win] + [bir+bhr | biz+bhz | bin]
    # realised as one MXU matmul one_hot(tokens) @ G (G precomputed in wrapper).
    tok = tok_ref[...]                                              # (T*Bp, 1) int32
    vocab_iota = lax.broadcasted_iota(jnp.int32, (Tl * Bp, Vp), 1)
    one_hot = (tok == vocab_iota).astype(jnp.float32)               # (T*Bp, Vp)
    gi = jnp.dot(one_hot, g_ref[...],
                 preferred_element_type=jnp.float32)                # (T*Bp, 3H)

    w_hh3 = whh_ref[...]                                            # (H, 3H) = [r|z|n]
    b_hn = bhn_ref[...]                                             # (1, H)

    # Hoisted loop invariants: per-step validity mask and PAD fill value.
    step_iota = lax.broadcasted_iota(jnp.int32, (Bp, Tl), 1)        # (Bp, T)
    valid_all = step_iota < len_ref[...]                            # (Bp, T) bool
    # pad_packed_sequence(padding_value=PAD token index); PAD_IDX == 0 here.
    pad_fill = jnp.full((Bp, H), float(PAD_IDX), jnp.float32)

    h = jnp.zeros((Bp, H), jnp.float32)                             # vreg-resident carry

    # T is small and static: fully unroll.  Only the single fused h @ W_hh3 dot is
    # truly serial; everything else was hoisted or sits in otherwise-idle slots.
    for t in range(Tl):
        gi_t = gi[t * Bp:(t + 1) * Bp]                              # (Bp, 3H) sublane-aligned
        gh = jnp.dot(h, w_hh3,
                     preferred_element_type=jnp.float32)            # (Bp, 3H) one MXU push

        # r, z: single EUP pass over the lane-concatenated (Bp, 2H) pre-activation.
        rz = jax.nn.sigmoid(gi_t[:, :2 * H] + gh[:, :2 * H])
        r = rz[:, :H]
        z = rz[:, H:]
        n = jnp.tanh(gi_t[:, 2 * H:] + r * (gh[:, 2 * H:] + b_hn))
        h_new = (1.0 - z) * n + z * h                               # (Bp, H)

        # Packed-sequence semantics: only advance h while t < length[b].
        valid = valid_all[:, t:t + 1]                               # (Bp, 1)
        h = jnp.where(valid, h_new, h)
        out_ref[t] = jnp.where(valid, h_new, pad_fill)              # direct aligned store

    hn_ref[0] = h                                                   # written once


@jax.jit
def encoder_forward(x_tokens, x_len, embed_table, w_ih, w_hh, b_ih, b_hh):
    """x_tokens: (T, B) int32; x_len: (B,) int32 (sorted desc., enforce_sorted=True).
    Returns (out (T,B,H), hn (1,B,H))."""
    Tl, Bl = x_tokens.shape
    H = w_hh.shape[1]                                               # (3H, H) -> hidden size
    Bp = ((Bl + 7) // 8) * 8                                        # pad batch to sublanes

    # --- fused, pre-folded parameters (tiny one-off work, fused under jit) ------
    w_i3 = jnp.concatenate(
        [w_ih[0 * H:1 * H].T, w_ih[1 * H:2 * H].T, w_ih[2 * H:3 * H].T], axis=1)  # (E, 3H)
    b_i3 = jnp.concatenate(
        [b_ih[0 * H:1 * H] + b_hh[0 * H:1 * H],        # fold b_hr into r bias (exact)
         b_ih[1 * H:2 * H] + b_hh[1 * H:2 * H],        # fold b_hz into z bias (exact)
         b_ih[2 * H:3 * H]])                           # b_in; b_hn stays in-kernel
    g_table = embed_table @ w_i3 + b_i3[None, :]                    # (VOCAB, 3H)
    # Pad the vocab (sublane) dim to a multiple of 8; padded rows are never selected.
    Vp = ((g_table.shape[0] + 7) // 8) * 8
    g_table = jnp.pad(g_table, ((0, Vp - g_table.shape[0]), (0, 0)))

    w_hh3 = jnp.concatenate(
        [w_hh[0 * H:1 * H].T, w_hh[1 * H:2 * H].T, w_hh[2 * H:3 * H].T], axis=1)  # (H, 3H)
    b_hn = b_hh[2 * H:3 * H].reshape(1, H)

    # --- batch padded to the sublane width; pad rows have length 0 --------------
    tok_p = jnp.pad(x_tokens.astype(jnp.int32), ((0, 0), (0, Bp - Bl)),
                    constant_values=PAD_IDX).reshape(Tl * Bp, 1)
    len_p = jnp.pad(x_len.astype(jnp.int32), (0, Bp - Bl)).reshape(Bp, 1)

    vmem = pl.BlockSpec(memory_space=pltpu.MemorySpace.VMEM)
    out_p, hn_p = pl.pallas_call(
        gru_kernel,
        out_shape=(
            jax.ShapeDtypeStruct((Tl, Bp, H), jnp.float32),
            jax.ShapeDtypeStruct((1, Bp, H), jnp.float32),
        ),
        in_specs=[vmem] * 5,
        out_specs=(vmem, vmem),
    )(tok_p, len_p,
      g_table.astype(jnp.float32), w_hh3.astype(jnp.float32), b_hn.astype(jnp.float32))

    return out_p[:, :Bl, :], hn_p[:, :Bl, :]


# ----------------------------- pure-JAX reference for verification --------------
def encoder_reference(x_tokens, x_len, embed_table, w_ih, w_hh, b_ih, b_hh):
    H = w_hh.shape[1]
    x_emb = embed_table[x_tokens]                                   # (T, B, E)

    def step(h, inp):
        x_t, t = inp
        gi = x_t @ w_ih.T + b_ih
        gh = h @ w_hh.T + b_hh
        r = jax.nn.sigmoid(gi[:, :H] + gh[:, :H])
        z = jax.nn.sigmoid(gi[:, H:2 * H] + gh[:, H:2 * H])
        n = jnp.tanh(gi[:, 2 * H:] + r * gh[:, 2 * H:])
        h_new = (1.0 - z) * n + z * h
        valid = (x_len > t)[:, None]
        h_upd = jnp.where(valid, h_new, h)
        out_t = jnp.where(valid, h_new, jnp.float32(PAD_IDX))
        return h_upd, out_t

    h0 = jnp.zeros((x_tokens.shape[1], H), jnp.float32)
    hn, out = lax.scan(step, h0, (x_emb, jnp.arange(x_tokens.shape[0])))
    return out, hn[None]


# ----------------------------- deterministic parameter init ---------------------
def init_params(key):
    k_emb, k1, k2, k3, k4 = jax.random.split(key, 5)
    embed_table = 0.1 * jax.random.normal(k_emb, (VOCAB, EMBED), jnp.float32)
    embed_table = embed_table.at[PAD_IDX].set(0.0)                  # padding_idx row is zero
    bound = 1.0 / jnp.sqrt(HIDDEN)
    w_ih = jax.random.uniform(k1, (3 * HIDDEN, EMBED), jnp.float32, -bound, bound)
    w_hh = jax.random.uniform(k2, (3 * HIDDEN, HIDDEN), jnp.float32, -bound, bound)
    b_ih = jax.random.uniform(k3, (3 * HIDDEN,), jnp.float32, -bound, bound)
    b_hh = jax.random.uniform(k4, (3 * HIDDEN,), jnp.float32, -bound, bound)
    return embed_table, w_ih, w_hh, b_ih, b_hh


if __name__ == "__main__":
    key = jax.random.PRNGKey(0)
    k_params, k_tok = jax.random.split(key)
    embed_table, w_ih, w_hh, b_ih, b_hh = init_params(k_params)

    # Lengths sorted descending (pack_padded_sequence enforce_sorted=True).
    x_len = jnp.array([T, 5], dtype=jnp.int32)                      # (B,)
    tokens = jax.random.randint(k_tok, (T, B), 1, VOCAB, dtype=jnp.int32)
    step_idx = jnp.arange(T)[:, None]
    x_tokens = jnp.where(step_idx < x_len[None, :], tokens, PAD_IDX)   # (T, B)

    out, hn = encoder_forward(x_tokens, x_len, embed_table, w_ih, w_hh, b_ih, b_hh)
    jax.block_until_ready((out, hn))

    ref_out, ref_hn = encoder_reference(x_tokens, x_len, embed_table, w_ih, w_hh, b_ih, b_hh)
    assert out.shape == (T, B, HIDDEN) and hn.shape == (1, B, HIDDEN)
    assert jnp.allclose(out, ref_out, atol=1e-5), "out mismatch"
    assert jnp.allclose(hn, ref_hn, atol=1e-5), "hn mismatch"

    print("KERNEL_OK")
</pallas_src>

<mosaic_0001>
module attributes {stable_mosaic.version = 11 : i64} {
  func.func @gru_kernel(%arg0: memref<64x1xi32, #tpu.memory_space<vmem>>, %arg1: memref<8x1xi32, #tpu.memory_space<vmem>>, %arg2: memref<24x96xf32, #tpu.memory_space<vmem>>, %arg3: memref<32x96xf32, #tpu.memory_space<vmem>>, %arg4: memref<1x32xf32, #tpu.memory_space<vmem>>, %arg5: memref<8x8x32xf32, #tpu.memory_space<vmem>>, %arg6: memref<1x8x32xf32, #tpu.memory_space<vmem>>) attributes {dimension_semantics = [], scalar_prefetch = 0 : i64, scratch_operands = 0 : i64, tpu.core_type = #tpu.core_type<tc>} {
    %c0 = arith.constant 0 : index
    %c0_0 = arith.constant 0 : index
    %0 = vector.load %arg0[%c0, %c0_0] : memref<64x1xi32, #tpu.memory_space<vmem>>, vector<64x1xi32>
    %1 = tpu.iota {dimensions = array<i32: 1>} : vector<64x24xi32>
    %2 = vector.broadcast %0 : vector<64x1xi32> to vector<64x24xi32>
    %3 = arith.cmpi eq, %2, %1 : vector<64x24xi32>
    %4 = arith.extui %3 : vector<64x24xi1> to vector<64x24xi32>
    %5 = arith.sitofp %4 : vector<64x24xi32> to vector<64x24xf32>
    %c0_1 = arith.constant 0 : index
    %c0_2 = arith.constant 0 : index
    %6 = vector.load %arg2[%c0_1, %c0_2] : memref<24x96xf32, #tpu.memory_space<vmem>>, vector<24x96xf32>
    %cst = arith.constant dense<0.000000e+00> : vector<64x96xf32>
    %7 = tpu.matmul %5, %6, %cst {dimension_numbers = #tpu.dot_dimension_numbers<[1], [0], [0], [1], [0, 0, 1, 1], [], []>} : vector<64x24xf32>, vector<24x96xf32>, vector<64x96xf32> -> vector<64x96xf32>
    %c0_3 = arith.constant 0 : index
    %c0_4 = arith.constant 0 : index
    %8 = vector.load %arg3[%c0_3, %c0_4] : memref<32x96xf32, #tpu.memory_space<vmem>>, vector<32x96xf32>
    %c0_5 = arith.constant 0 : index
    %c0_6 = arith.constant 0 : index
    %9 = vector.load %arg4[%c0_5, %c0_6] : memref<1x32xf32, #tpu.memory_space<vmem>>, vector<1x32xf32>
    %10 = tpu.iota {dimensions = array<i32: 1>} : vector<8x8xi32>
    %c0_7 = arith.constant 0 : index
    %c0_8 = arith.constant 0 : index
    %11 = vector.load %arg1[%c0_7, %c0_8] : memref<8x1xi32, #tpu.memory_space<vmem>>, vector<8x1xi32>
    %12 = vector.broadcast %11 : vector<8x1xi32> to vector<8x8xi32>
    %13 = arith.cmpi slt, %10, %12 : vector<8x8xi32>
    %cst_9 = arith.constant 0.000000e+00 : f32
    %14 = vector.broadcast %cst_9 : f32 to vector<8x32xf32>
    %cst_10 = arith.constant 0.000000e+00 : f32
    %15 = vector.broadcast %cst_10 : f32 to vector<8x32xf32>
    %16 = vector.extract_strided_slice %7 {offsets = [0, 0], sizes = [8, 96], strides = [1, 1]} : vector<64x96xf32> to vector<8x96xf32>
    %cst_11 = arith.constant dense<0.000000e+00> : vector<8x96xf32>
    %17 = tpu.matmul %15, %8, %cst_11 {dimension_numbers = #tpu.dot_dimension_numbers<[1], [0], [0], [1], [0, 0, 1, 1], [], []>} : vector<8x32xf32>, vector<32x96xf32>, vector<8x96xf32> -> vector<8x96xf32>
    %18 = vector.extract_strided_slice %16 {offsets = [0, 0], sizes = [8, 64], strides = [1, 1]} : vector<8x96xf32> to vector<8x64xf32>
    %19 = vector.extract_strided_slice %17 {offsets = [0, 0], sizes = [8, 64], strides = [1, 1]} : vector<8x96xf32> to vector<8x64xf32>
    %20 = arith.addf %18, %19 : vector<8x64xf32>
    %21 = arith.negf %20 : vector<8x64xf32>
    %22 = math.exp %21 : vector<8x64xf32>
    %cst_12 = arith.constant 1.000000e+00 : f32
    %23 = vector.broadcast %cst_12 : f32 to vector<8x64xf32>
    %24 = arith.addf %23, %22 : vector<8x64xf32>
    %25 = arith.divf %23, %24 : vector<8x64xf32>
    %26 = vector.extract_strided_slice %25 {offsets = [0, 0], sizes = [8, 32], strides = [1, 1]} : vector<8x64xf32> to vector<8x32xf32>
    %27 = vector.extract_strided_slice %25 {offsets = [0, 32], sizes = [8, 32], strides = [1, 1]} : vector<8x64xf32> to vector<8x32xf32>
    %28 = vector.extract_strided_slice %16 {offsets = [0, 64], sizes = [8, 32], strides = [1, 1]} : vector<8x96xf32> to vector<8x32xf32>
    %29 = vector.extract_strided_slice %17 {offsets = [0, 64], sizes = [8, 32], strides = [1, 1]} : vector<8x96xf32> to vector<8x32xf32>
    %30 = vector.broadcast %9 : vector<1x32xf32> to vector<8x32xf32>
    %31 = arith.addf %29, %30 : vector<8x32xf32>
    %32 = arith.mulf %26, %31 : vector<8x32xf32>
    %33 = arith.addf %28, %32 : vector<8x32xf32>
    %34 = math.tanh %33 : vector<8x32xf32>
    %cst_13 = arith.constant 1.000000e+00 : f32
    %35 = vector.broadcast %cst_13 : f32 to vector<8x32xf32>
    %36 = arith.subf %35, %27 : vector<8x32xf32>
    %37 = arith.mulf %36, %34 : vector<8x32xf32>
    %38 = arith.mulf %27, %15 : vector<8x32xf32>
    %39 = arith.addf %37, %38 : vector<8x32xf32>
    %40 = vector.extract_strided_slice %13 {offsets = [0, 0], sizes = [8, 1], strides = [1, 1]} : vector<8x8xi1> to vector<8x1xi1>
    %41 = vector.shape_cast %40 : vector<8x1xi1> to vector<8x1xi1>
    %42 = vector.broadcast %41 : vector<8x1xi1> to vector<8x32xi1>
    %43 = arith.select %42, %39, %15 : vector<8x32xi1>, vector<8x32xf32>
    %44 = vector.shape_cast %40 : vector<8x1xi1> to vector<8x1xi1>
    %45 = vector.broadcast %44 : vector<8x1xi1> to vector<8x32xi1>
    %46 = arith.select %45, %39, %14 : vector<8x32xi1>, vector<8x32xf32>
    %c0_14 = arith.constant 0 : index
    %c0_15 = arith.constant 0 : index
    %c0_16 = arith.constant 0 : index
    %47 = vector.load %arg5[%c0_14, %c0_15, %c0_16] : memref<8x8x32xf32, #tpu.memory_space<vmem>>, vector<1x8x32xf32>
    %48 = vector.shape_cast %47 : vector<1x8x32xf32> to vector<8x32xf32>
    %49 = vector.shape_cast %46 : vector<8x32xf32> to vector<1x8x32xf32>
    tpu.vector_store %arg5[%c0_14, %c0_15, %c0_16], %49 {strides = array<i32>} : memref<8x8x32xf32, #tpu.memory_space<vmem>>, vector<1x8x32xf32>,
    %50 = vector.extract_strided_slice %7 {offsets = [8, 0], sizes = [8, 96], strides = [1, 1]} : vector<64x96xf32> to vector<8x96xf32>
    %cst_17 = arith.constant dense<0.000000e+00> : vector<8x96xf32>
    %51 = tpu.matmul %43, %8, %cst_17 {dimension_numbers = #tpu.dot_dimension_numbers<[1], [0], [0], [1], [0, 0, 1, 1], [], []>} : vector<8x32xf32>, vector<32x96xf32>, vector<8x96xf32> -> vector<8x96xf32>
    %52 = vector.extract_strided_slice %50 {offsets = [0, 0], sizes = [8, 64], strides = [1, 1]} : vector<8x96xf32> to vector<8x64xf32>
    %53 = vector.extract_strided_slice %51 {offsets = [0, 0], sizes = [8, 64], strides = [1, 1]} : vector<8x96xf32> to vector<8x64xf32>
    %54 = arith.addf %52, %53 : vector<8x64xf32>
    %55 = arith.negf %54 : vector<8x64xf32>
    %56 = math.exp %55 : vector<8x64xf32>
    %cst_18 = arith.constant 1.000000e+00 : f32
    %57 = vector.broadcast %cst_18 : f32 to vector<8x64xf32>
    %58 = arith.addf %57, %56 : vector<8x64xf32>
    %59 = arith.divf %57, %58 : vector<8x64xf32>
    %60 = vector.extract_strided_slice %59 {offsets = [0, 0], sizes = [8, 32], strides = [1, 1]} : vector<8x64xf32> to vector<8x32xf32>
    %61 = vector.extract_strided_slice %59 {offsets = [0, 32], sizes = [8, 32], strides = [1, 1]} : vector<8x64xf32> to vector<8x32xf32>
    %62 = vector.extract_strided_slice %50 {offsets = [0, 64], sizes = [8, 32], strides = [1, 1]} : vector<8x96xf32> to vector<8x32xf32>
    %63 = vector.extract_strided_slice %51 {offsets = [0, 64], sizes = [8, 32], strides = [1, 1]} : vector<8x96xf32> to vector<8x32xf32>
    %64 = vector.broadcast %9 : vector<1x32xf32> to vector<8x32xf32>
    %65 = arith.addf %63, %64 : vector<8x32xf32>
    %66 = arith.mulf %60, %65 : vector<8x32xf32>
    %67 = arith.addf %62, %66 : vector<8x32xf32>
    %68 = math.tanh %67 : vector<8x32xf32>
    %cst_19 = arith.constant 1.000000e+00 : f32
    %69 = vector.broadcast %cst_19 : f32 to vector<8x32xf32>
    %70 = arith.subf %69, %61 : vector<8x32xf32>
    %71 = arith.mulf %70, %68 : vector<8x32xf32>
    %72 = arith.mulf %61, %43 : vector<8x32xf32>
    %73 = arith.addf %71, %72 : vector<8x32xf32>
    %74 = vector.extract_strided_slice %13 {offsets = [0, 1], sizes = [8, 1], strides = [1, 1]} : vector<8x8xi1> to vector<8x1xi1>
    %75 = vector.shape_cast %74 : vector<8x1xi1> to vector<8x1xi1>
    %76 = vector.broadcast %75 : vector<8x1xi1> to vector<8x32xi1>
    %77 = arith.select %76, %73, %43 : vector<8x32xi1>, vector<8x32xf32>
    %78 = vector.shape_cast %74 : vector<8x1xi1> to vector<8x1xi1>
    %79 = vector.broadcast %78 : vector<8x1xi1> to vector<8x32xi1>
    %80 = arith.select %79, %73, %14 : vector<8x32xi1>, vector<8x32xf32>
    %c1 = arith.constant 1 : index
    %c0_20 = arith.constant 0 : index
    %c0_21 = arith.constant 0 : index
    %81 = vector.load %arg5[%c1, %c0_20, %c0_21] : memref<8x8x32xf32, #tpu.memory_space<vmem>>, vector<1x8x32xf32>
    %82 = vector.shape_cast %81 : vector<1x8x32xf32> to vector<8x32xf32>
    %83 = vector.shape_cast %80 : vector<8x32xf32> to vector<1x8x32xf32>
    tpu.vector_store %arg5[%c1, %c0_20, %c0_21], %83 {strides = array<i32>} : memref<8x8x32xf32, #tpu.memory_space<vmem>>, vector<1x8x32xf32>,
    %84 = vector.extract_strided_slice %7 {offsets = [16, 0], sizes = [8, 96], strides = [1, 1]} : vector<64x96xf32> to vector<8x96xf32>
    %cst_22 = arith.constant dense<0.000000e+00> : vector<8x96xf32>
    %85 = tpu.matmul %77, %8, %cst_22 {dimension_numbers = #tpu.dot_dimension_numbers<[1], [0], [0], [1], [0, 0, 1, 1], [], []>} : vector<8x32xf32>, vector<32x96xf32>, vector<8x96xf32> -> vector<8x96xf32>
    %86 = vector.extract_strided_slice %84 {offsets = [0, 0], sizes = [8, 64], strides = [1, 1]} : vector<8x96xf32> to vector<8x64xf32>
    %87 = vector.extract_strided_slice %85 {offsets = [0, 0], sizes = [8, 64], strides = [1, 1]} : vector<8x96xf32> to vector<8x64xf32>
    %88 = arith.addf %86, %87 : vector<8x64xf32>
    %89 = arith.negf %88 : vector<8x64xf32>
    %90 = math.exp %89 : vector<8x64xf32>
    %cst_23 = arith.constant 1.000000e+00 : f32
    %91 = vector.broadcast %cst_23 : f32 to vector<8x64xf32>
    %92 = arith.addf %91, %90 : vector<8x64xf32>
    %93 = arith.divf %91, %92 : vector<8x64xf32>
    %94 = vector.extract_strided_slice %93 {offsets = [0, 0], sizes = [8, 32], strides = [1, 1]} : vector<8x64xf32> to vector<8x32xf32>
    %95 = vector.extract_strided_slice %93 {offsets = [0, 32], sizes = [8, 32], strides = [1, 1]} : vector<8x64xf32> to vector<8x32xf32>
    %96 = vector.extract_strided_slice %84 {offsets = [0, 64], sizes = [8, 32], strides = [1, 1]} : vector<8x96xf32> to vector<8x32xf32>
    %97 = vector.extract_strided_slice %85 {offsets = [0, 64], sizes = [8, 32], strides = [1, 1]} : vector<8x96xf32> to vector<8x32xf32>
    %98 = vector.broadcast %9 : vector<1x32xf32> to vector<8x32xf32>
    %99 = arith.addf %97, %98 : vector<8x32xf32>
    %100 = arith.mulf %94, %99 : vector<8x32xf32>
    %101 = arith.addf %96, %100 : vector<8x32xf32>
    %102 = math.tanh %101 : vector<8x32xf32>
    %cst_24 = arith.constant 1.000000e+00 : f32
    %103 = vector.broadcast %cst_24 : f32 to vector<8x32xf32>
    %104 = arith.subf %103, %95 : vector<8x32xf32>
    %105 = arith.mulf %104, %102 : vector<8x32xf32>
    %106 = arith.mulf %95, %77 : vector<8x32xf32>
    %107 = arith.addf %105, %106 : vector<8x32xf32>
    %108 = vector.extract_strided_slice %13 {offsets = [0, 2], sizes = [8, 1], strides = [1, 1]} : vector<8x8xi1> to vector<8x1xi1>
    %109 = vector.shape_cast %108 : vector<8x1xi1> to vector<8x1xi1>
    %110 = vector.broadcast %109 : vector<8x1xi1> to vector<8x32xi1>
    %111 = arith.select %110, %107, %77 : vector<8x32xi1>, vector<8x32xf32>
    %112 = vector.shape_cast %108 : vector<8x1xi1> to vector<8x1xi1>
    %113 = vector.broadcast %112 : vector<8x1xi1> to vector<8x32xi1>
    %114 = arith.select %113, %107, %14 : vector<8x32xi1>, vector<8x32xf32>
    %c2 = arith.constant 2 : index
    %c0_25 = arith.constant 0 : index
    %c0_26 = arith.constant 0 : index
    %115 = vector.load %arg5[%c2, %c0_25, %c0_26] : memref<8x8x32xf32, #tpu.memory_space<vmem>>, vector<1x8x32xf32>
    %116 = vector.shape_cast %115 : vector<1x8x32xf32> to vector<8x32xf32>
    %117 = vector.shape_cast %114 : vector<8x32xf32> to vector<1x8x32xf32>
    tpu.vector_store %arg5[%c2, %c0_25, %c0_26], %117 {strides = array<i32>} : memref<8x8x32xf32, #tpu.memory_space<vmem>>, vector<1x8x32xf32>,
    %118 = vector.extract_strided_slice %7 {offsets = [24, 0], sizes = [8, 96], strides = [1, 1]} : vector<64x96xf32> to vector<8x96xf32>
    %cst_27 = arith.constant dense<0.000000e+00> : vector<8x96xf32>
    %119 = tpu.matmul %111, %8, %cst_27 {dimension_numbers = #tpu.dot_dimension_numbers<[1], [0], [0], [1], [0, 0, 1, 1], [], []>} : vector<8x32xf32>, vector<32x96xf32>, vector<8x96xf32> -> vector<8x96xf32>
    %120 = vector.extract_strided_slice %118 {offsets = [0, 0], sizes = [8, 64], strides = [1, 1]} : vector<8x96xf32> to vector<8x64xf32>
    %121 = vector.extract_strided_slice %119 {offsets = [0, 0], sizes = [8, 64], strides = [1, 1]} : vector<8x96xf32> to vector<8x64xf32>
    %122 = arith.addf %120, %121 : vector<8x64xf32>
    %123 = arith.negf %122 : vector<8x64xf32>
    %124 = math.exp %123 : vector<8x64xf32>
    %cst_28 = arith.constant 1.000000e+00 : f32
    %125 = vector.broadcast %cst_28 : f32 to vector<8x64xf32>
    %126 = arith.addf %125, %124 : vector<8x64xf32>
    %127 = arith.divf %125, %126 : vector<8x64xf32>
    %128 = vector.extract_strided_slice %127 {offsets = [0, 0], sizes = [8, 32], strides = [1, 1]} : vector<8x64xf32> to vector<8x32xf32>
    %129 = vector.extract_strided_slice %127 {offsets = [0, 32], sizes = [8, 32], strides = [1, 1]} : vector<8x64xf32> to vector<8x32xf32>
    %130 = vector.extract_strided_slice %118 {offsets = [0, 64], sizes = [8, 32], strides = [1, 1]} : vector<8x96xf32> to vector<8x32xf32>
    %131 = vector.extract_strided_slice %119 {offsets = [0, 64], sizes = [8, 32], strides = [1, 1]} : vector<8x96xf32> to vector<8x32xf32>
    %132 = vector.broadcast %9 : vector<1x32xf32> to vector<8x32xf32>
    %133 = arith.addf %131, %132 : vector<8x32xf32>
    %134 = arith.mulf %128, %133 : vector<8x32xf32>
    %135 = arith.addf %130, %134 : vector<8x32xf32>
    %136 = math.tanh %135 : vector<8x32xf32>
    %cst_29 = arith.constant 1.000000e+00 : f32
    %137 = vector.broadcast %cst_29 : f32 to vector<8x32xf32>
    %138 = arith.subf %137, %129 : vector<8x32xf32>
    %139 = arith.mulf %138, %136 : vector<8x32xf32>
    %140 = arith.mulf %129, %111 : vector<8x32xf32>
    %141 = arith.addf %139, %140 : vector<8x32xf32>
    %142 = vector.extract_strided_slice %13 {offsets = [0, 3], sizes = [8, 1], strides = [1, 1]} : vector<8x8xi1> to vector<8x1xi1>
    %143 = vector.shape_cast %142 : vector<8x1xi1> to vector<8x1xi1>
    %144 = vector.broadcast %143 : vector<8x1xi1> to vector<8x32xi1>
    %145 = arith.select %144, %141, %111 : vector<8x32xi1>, vector<8x32xf32>
    %146 = vector.shape_cast %142 : vector<8x1xi1> to vector<8x1xi1>
    %147 = vector.broadcast %146 : vector<8x1xi1> to vector<8x32xi1>
    %148 = arith.select %147, %141, %14 : vector<8x32xi1>, vector<8x32xf32>
    %c3 = arith.constant 3 : index
    %c0_30 = arith.constant 0 : index
    %c0_31 = arith.constant 0 : index
    %149 = vector.load %arg5[%c3, %c0_30, %c0_31] : memref<8x8x32xf32, #tpu.memory_space<vmem>>, vector<1x8x32xf32>
    %150 = vector.shape_cast %149 : vector<1x8x32xf32> to vector<8x32xf32>
    %151 = vector.shape_cast %148 : vector<8x32xf32> to vector<1x8x32xf32>
    tpu.vector_store %arg5[%c3, %c0_30, %c0_31], %151 {strides = array<i32>} : memref<8x8x32xf32, #tpu.memory_space<vmem>>, vector<1x8x32xf32>,
    %152 = vector.extract_strided_slice %7 {offsets = [32, 0], sizes = [8, 96], strides = [1, 1]} : vector<64x96xf32> to vector<8x96xf32>
    %cst_32 = arith.constant dense<0.000000e+00> : vector<8x96xf32>
    %153 = tpu.matmul %145, %8, %cst_32 {dimension_numbers = #tpu.dot_dimension_numbers<[1], [0], [0], [1], [0, 0, 1, 1], [], []>} : vector<8x32xf32>, vector<32x96xf32>, vector<8x96xf32> -> vector<8x96xf32>
    %154 = vector.extract_strided_slice %152 {offsets = [0, 0], sizes = [8, 64], strides = [1, 1]} : vector<8x96xf32> to vector<8x64xf32>
    %155 = vector.extract_strided_slice %153 {offsets = [0, 0], sizes = [8, 64], strides = [1, 1]} : vector<8x96xf32> to vector<8x64xf32>
    %156 = arith.addf %154, %155 : vector<8x64xf32>
    %157 = arith.negf %156 : vector<8x64xf32>
    %158 = math.exp %157 : vector<8x64xf32>
    %cst_33 = arith.constant 1.000000e+00 : f32
    %159 = vector.broadcast %cst_33 : f32 to vector<8x64xf32>
    %160 = arith.addf %159, %158 : vector<8x64xf32>
    %161 = arith.divf %159, %160 : vector<8x64xf32>
    %162 = vector.extract_strided_slice %161 {offsets = [0, 0], sizes = [8, 32], strides = [1, 1]} : vector<8x64xf32> to vector<8x32xf32>
    %163 = vector.extract_strided_slice %161 {offsets = [0, 32], sizes = [8, 32], strides = [1, 1]} : vector<8x64xf32> to vector<8x32xf32>
    %164 = vector.extract_strided_slice %152 {offsets = [0, 64], sizes = [8, 32], strides = [1, 1]} : vector<8x96xf32> to vector<8x32xf32>
    %165 = vector.extract_strided_slice %153 {offsets = [0, 64], sizes = [8, 32], strides = [1, 1]} : vector<8x96xf32> to vector<8x32xf32>
    %166 = vector.broadcast %9 : vector<1x32xf32> to vector<8x32xf32>
    %167 = arith.addf %165, %166 : vector<8x32xf32>
    %168 = arith.mulf %162, %167 : vector<8x32xf32>
    %169 = arith.addf %164, %168 : vector<8x32xf32>
    %170 = math.tanh %169 : vector<8x32xf32>
    %cst_34 = arith.constant 1.000000e+00 : f32
    %171 = vector.broadcast %cst_34 : f32 to vector<8x32xf32>
    %172 = arith.subf %171, %163 : vector<8x32xf32>
    %173 = arith.mulf %172, %170 : vector<8x32xf32>
    %174 = arith.mulf %163, %145 : vector<8x32xf32>
    %175 = arith.addf %173, %174 : vector<8x32xf32>
    %176 = vector.extract_strided_slice %13 {offsets = [0, 4], sizes = [8, 1], strides = [1, 1]} : vector<8x8xi1> to vector<8x1xi1>
    %177 = vector.shape_cast %176 : vector<8x1xi1> to vector<8x1xi1>
    %178 = vector.broadcast %177 : vector<8x1xi1> to vector<8x32xi1>
    %179 = arith.select %178, %175, %145 : vector<8x32xi1>, vector<8x32xf32>
    %180 = vector.shape_cast %176 : vector<8x1xi1> to vector<8x1xi1>
    %181 = vector.broadcast %180 : vector<8x1xi1> to vector<8x32xi1>
    %182 = arith.select %181, %175, %14 : vector<8x32xi1>, vector<8x32xf32>
    %c4 = arith.constant 4 : index
    %c0_35 = arith.constant 0 : index
    %c0_36 = arith.constant 0 : index
    %183 = vector.load %arg5[%c4, %c0_35, %c0_36] : memref<8x8x32xf32, #tpu.memory_space<vmem>>, vector<1x8x32xf32>
    %184 = vector.shape_cast %183 : vector<1x8x32xf32> to vector<8x32xf32>
    %185 = vector.shape_cast %182 : vector<8x32xf32> to vector<1x8x32xf32>
    tpu.vector_store %arg5[%c4, %c0_35, %c0_36], %185 {strides = array<i32>} : memref<8x8x32xf32, #tpu.memory_space<vmem>>, vector<1x8x32xf32>,
    %186 = vector.extract_strided_slice %7 {offsets = [40, 0], sizes = [8, 96], strides = [1, 1]} : vector<64x96xf32> to vector<8x96xf32>
    %cst_37 = arith.constant dense<0.000000e+00> : vector<8x96xf32>
    %187 = tpu.matmul %179, %8, %cst_37 {dimension_numbers = #tpu.dot_dimension_numbers<[1], [0], [0], [1], [0, 0, 1, 1], [], []>} : vector<8x32xf32>, vector<32x96xf32>, vector<8x96xf32> -> vector<8x96xf32>
    %188 = vector.extract_strided_slice %186 {offsets = [0, 0], sizes = [8, 64], strides = [1, 1]} : vector<8x96xf32> to vector<8x64xf32>
    %189 = vector.extract_strided_slice %187 {offsets = [0, 0], sizes = [8, 64], strides = [1, 1]} : vector<8x96xf32> to vector<8x64xf32>
    %190 = arith.addf %188, %189 : vector<8x64xf32>
    %191 = arith.negf %190 : vector<8x64xf32>
    %192 = math.exp %191 : vector<8x64xf32>
    %cst_38 = arith.constant 1.000000e+00 : f32
    %193 = vector.broadcast %cst_38 : f32 to vector<8x64xf32>
    %194 = arith.addf %193, %192 : vector<8x64xf32>
    %195 = arith.divf %193, %194 : vector<8x64xf32>
    %196 = vector.extract_strided_slice %195 {offsets = [0, 0], sizes = [8, 32], strides = [1, 1]} : vector<8x64xf32> to vector<8x32xf32>
    %197 = vector.extract_strided_slice %195 {offsets = [0, 32], sizes = [8, 32], strides = [1, 1]} : vector<8x64xf32> to vector<8x32xf32>
    %198 = vector.extract_strided_slice %186 {offsets = [0, 64], sizes = [8, 32], strides = [1, 1]} : vector<8x96xf32> to vector<8x32xf32>
    %199 = vector.extract_strided_slice %187 {offsets = [0, 64], sizes = [8, 32], strides = [1, 1]} : vector<8x96xf32> to vector<8x32xf32>
    %200 = vector.broadcast %9 : vector<1x32xf32> to vector<8x32xf32>
    %201 = arith.addf %199, %200 : vector<8x32xf32>
    %202 = arith.mulf %196, %201 : vector<8x32xf32>
    %203 = arith.addf %198, %202 : vector<8x32xf32>
    %204 = math.tanh %203 : vector<8x32xf32>
    %cst_39 = arith.constant 1.000000e+00 : f32
    %205 = vector.broadcast %cst_39 : f32 to vector<8x32xf32>
    %206 = arith.subf %205, %197 : vector<8x32xf32>
    %207 = arith.mulf %206, %204 : vector<8x32xf32>
    %208 = arith.mulf %197, %179 : vector<8x32xf32>
    %209 = arith.addf %207, %208 : vector<8x32xf32>
    %210 = vector.extract_strided_slice %13 {offsets = [0, 5], sizes = [8, 1], strides = [1, 1]} : vector<8x8xi1> to vector<8x1xi1>
    %211 = vector.shape_cast %210 : vector<8x1xi1> to vector<8x1xi1>
    %212 = vector.broadcast %211 : vector<8x1xi1> to vector<8x32xi1>
    %213 = arith.select %212, %209, %179 : vector<8x32xi1>, vector<8x32xf32>
    %214 = vector.shape_cast %210 : vector<8x1xi1> to vector<8x1xi1>
    %215 = vector.broadcast %214 : vector<8x1xi1> to vector<8x32xi1>
    %216 = arith.select %215, %209, %14 : vector<8x32xi1>, vector<8x32xf32>
    %c5 = arith.constant 5 : index
    %c0_40 = arith.constant 0 : index
    %c0_41 = arith.constant 0 : index
    %217 = vector.load %arg5[%c5, %c0_40, %c0_41] : memref<8x8x32xf32, #tpu.memory_space<vmem>>, vector<1x8x32xf32>
    %218 = vector.shape_cast %217 : vector<1x8x32xf32> to vector<8x32xf32>
    %219 = vector.shape_cast %216 : vector<8x32xf32> to vector<1x8x32xf32>
    tpu.vector_store %arg5[%c5, %c0_40, %c0_41], %219 {strides = array<i32>} : memref<8x8x32xf32, #tpu.memory_space<vmem>>, vector<1x8x32xf32>,
    %220 = vector.extract_strided_slice %7 {offsets = [48, 0], sizes = [8, 96], strides = [1, 1]} : vector<64x96xf32> to vector<8x96xf32>
    %cst_42 = arith.constant dense<0.000000e+00> : vector<8x96xf32>
    %221 = tpu.matmul %213, %8, %cst_42 {dimension_numbers = #tpu.dot_dimension_numbers<[1], [0], [0], [1], [0, 0, 1, 1], [], []>} : vector<8x32xf32>, vector<32x96xf32>, vector<8x96xf32> -> vector<8x96xf32>
    %222 = vector.extract_strided_slice %220 {offsets = [0, 0], sizes = [8, 64], strides = [1, 1]} : vector<8x96xf32> to vector<8x64xf32>
    %223 = vector.extract_strided_slice %221 {offsets = [0, 0], sizes = [8, 64], strides = [1, 1]} : vector<8x96xf32> to vector<8x64xf32>
    %224 = arith.addf %222, %223 : vector<8x64xf32>
    %225 = arith.negf %224 : vector<8x64xf32>
    %226 = math.exp %225 : vector<8x64xf32>
    %cst_43 = arith.constant 1.000000e+00 : f32
    %227 = vector.broadcast %cst_43 : f32 to vector<8x64xf32>
    %228 = arith.addf %227, %226 : vector<8x64xf32>
    %229 = arith.divf %227, %228 : vector<8x64xf32>
    %230 = vector.extract_strided_slice %229 {offsets = [0, 0], sizes = [8, 32], strides = [1, 1]} : vector<8x64xf32> to vector<8x32xf32>
    %231 = vector.extract_strided_slice %229 {offsets = [0, 32], sizes = [8, 32], strides = [1, 1]} : vector<8x64xf32> to vector<8x32xf32>
    %232 = vector.extract_strided_slice %220 {offsets = [0, 64], sizes = [8, 32], strides = [1, 1]} : vector<8x96xf32> to vector<8x32xf32>
    %233 = vector.extract_strided_slice %221 {offsets = [0, 64], sizes = [8, 32], strides = [1, 1]} : vector<8x96xf32> to vector<8x32xf32>
    %234 = vector.broadcast %9 : vector<1x32xf32> to vector<8x32xf32>
    %235 = arith.addf %233, %234 : vector<8x32xf32>
    %236 = arith.mulf %230, %235 : vector<8x32xf32>
    %237 = arith.addf %232, %236 : vector<8x32xf32>
    %238 = math.tanh %237 : vector<8x32xf32>
    %cst_44 = arith.constant 1.000000e+00 : f32
    %239 = vector.broadcast %cst_44 : f32 to vector<8x32xf32>
    %240 = arith.subf %239, %231 : vector<8x32xf32>
    %241 = arith.mulf %240, %238 : vector<8x32xf32>
    %242 = arith.mulf %231, %213 : vector<8x32xf32>
    %243 = arith.addf %241, %242 : vector<8x32xf32>
    %244 = vector.extract_strided_slice %13 {offsets = [0, 6], sizes = [8, 1], strides = [1, 1]} : vector<8x8xi1> to vector<8x1xi1>
    %245 = vector.shape_cast %244 : vector<8x1xi1> to vector<8x1xi1>
    %246 = vector.broadcast %245 : vector<8x1xi1> to vector<8x32xi1>
    %247 = arith.select %246, %243, %213 : vector<8x32xi1>, vector<8x32xf32>
    %248 = vector.shape_cast %244 : vector<8x1xi1> to vector<8x1xi1>
    %249 = vector.broadcast %248 : vector<8x1xi1> to vector<8x32xi1>
    %250 = arith.select %249, %243, %14 : vector<8x32xi1>, vector<8x32xf32>
    %c6 = arith.constant 6 : index
    %c0_45 = arith.constant 0 : index
    %c0_46 = arith.constant 0 : index
    %251 = vector.load %arg5[%c6, %c0_45, %c0_46] : memref<8x8x32xf32, #tpu.memory_space<vmem>>, vector<1x8x32xf32>
    %252 = vector.shape_cast %251 : vector<1x8x32xf32> to vector<8x32xf32>
    %253 = vector.shape_cast %250 : vector<8x32xf32> to vector<1x8x32xf32>
    tpu.vector_store %arg5[%c6, %c0_45, %c0_46], %253 {strides = array<i32>} : memref<8x8x32xf32, #tpu.memory_space<vmem>>, vector<1x8x32xf32>,
    %254 = vector.extract_strided_slice %7 {offsets = [56, 0], sizes = [8, 96], strides = [1, 1]} : vector<64x96xf32> to vector<8x96xf32>
    %cst_47 = arith.constant dense<0.000000e+00> : vector<8x96xf32>
    %255 = tpu.matmul %247, %8, %cst_47 {dimension_numbers = #tpu.dot_dimension_numbers<[1], [0], [0], [1], [0, 0, 1, 1], [], []>} : vector<8x32xf32>, vector<32x96xf32>, vector<8x96xf32> -> vector<8x96xf32>
    %256 = vector.extract_strided_slice %254 {offsets = [0, 0], sizes = [8, 64], strides = [1, 1]} : vector<8x96xf32> to vector<8x64xf32>
    %257 = vector.extract_strided_slice %255 {offsets = [0, 0], sizes = [8, 64], strides = [1, 1]} : vector<8x96xf32> to vector<8x64xf32>
    %258 = arith.addf %256, %257 : vector<8x64xf32>
    %259 = arith.negf %258 : vector<8x64xf32>
    %260 = math.exp %259 : vector<8x64xf32>
    %cst_48 = arith.constant 1.000000e+00 : f32
    %261 = vector.broadcast %cst_48 : f32 to vector<8x64xf32>
    %262 = arith.addf %261, %260 : vector<8x64xf32>
    %263 = arith.divf %261, %262 : vector<8x64xf32>
    %264 = vector.extract_strided_slice %263 {offsets = [0, 0], sizes = [8, 32], strides = [1, 1]} : vector<8x64xf32> to vector<8x32xf32>
    %265 = vector.extract_strided_slice %263 {offsets = [0, 32], sizes = [8, 32], strides = [1, 1]} : vector<8x64xf32> to vector<8x32xf32>
    %266 = vector.extract_strided_slice %254 {offsets = [0, 64], sizes = [8, 32], strides = [1, 1]} : vector<8x96xf32> to vector<8x32xf32>
    %267 = vector.extract_strided_slice %255 {offsets = [0, 64], sizes = [8, 32], strides = [1, 1]} : vector<8x96xf32> to vector<8x32xf32>
    %268 = vector.broadcast %9 : vector<1x32xf32> to vector<8x32xf32>
    %269 = arith.addf %267, %268 : vector<8x32xf32>
    %270 = arith.mulf %264, %269 : vector<8x32xf32>
    %271 = arith.addf %266, %270 : vector<8x32xf32>
    %272 = math.tanh %271 : vector<8x32xf32>
    %cst_49 = arith.constant 1.000000e+00 : f32
    %273 = vector.broadcast %cst_49 : f32 to vector<8x32xf32>
    %274 = arith.subf %273, %265 : vector<8x32xf32>
    %275 = arith.mulf %274, %272 : vector<8x32xf32>
    %276 = arith.mulf %265, %247 : vector<8x32xf32>
    %277 = arith.addf %275, %276 : vector<8x32xf32>
    %278 = vector.extract_strided_slice %13 {offsets = [0, 7], sizes = [8, 1], strides = [1, 1]} : vector<8x8xi1> to vector<8x1xi1>
    %279 = vector.shape_cast %278 : vector<8x1xi1> to vector<8x1xi1>
    %280 = vector.broadcast %279 : vector<8x1xi1> to vector<8x32xi1>
    %281 = arith.select %280, %277, %247 : vector<8x32xi1>, vector<8x32xf32>
    %282 = vector.shape_cast %278 : vector<8x1xi1> to vector<8x1xi1>
    %283 = vector.broadcast %282 : vector<8x1xi1> to vector<8x32xi1>
    %284 = arith.select %283, %277, %14 : vector<8x32xi1>, vector<8x32xf32>
    %c7 = arith.constant 7 : index
    %c0_50 = arith.constant 0 : index
    %c0_51 = arith.constant 0 : index
    %285 = vector.load %arg5[%c7, %c0_50, %c0_51] : memref<8x8x32xf32, #tpu.memory_space<vmem>>, vector<1x8x32xf32>
    %286 = vector.shape_cast %285 : vector<1x8x32xf32> to vector<8x32xf32>
    %287 = vector.shape_cast %284 : vector<8x32xf32> to vector<1x8x32xf32>
    tpu.vector_store %arg5[%c7, %c0_50, %c0_51], %287 {strides = array<i32>} : memref<8x8x32xf32, #tpu.memory_space<vmem>>, vector<1x8x32xf32>,
    %c0_52 = arith.constant 0 : index
    %c0_53 = arith.constant 0 : index
    %c0_54 = arith.constant 0 : index
    %288 = vector.load %arg6[%c0_52, %c0_53, %c0_54] : memref<1x8x32xf32, #tpu.memory_space<vmem>>, vector<1x8x32xf32>
    %289 = vector.shape_cast %288 : vector<1x8x32xf32> to vector<8x32xf32>
    %290 = vector.shape_cast %281 : vector<8x32xf32> to vector<1x8x32xf32>
    tpu.vector_store %arg6[%c0_52, %c0_53, %c0_54], %290 {strides = array<i32>} : memref<1x8x32xf32, #tpu.memory_space<vmem>>, vector<1x8x32xf32>,
    return
  }
}

</mosaic_0001>

<bundles_post_ra>
// kernel: encoder_forward.1
= control target key start
LH: loop header
LB: loop body
LE: loop exit
PB: predicated region body
PF: predicated region fallthrough
CT: control target
= control target key end

     0   :  { %v905_v0 = vmov 0   ;;  %s906_s16 = smov 64   ;;  %v30_v11 = vlaneseq  ;;  %vm83_vm0 = vcmask 195584   ;;  %v907_v14 = vmov 0.0   ;;  %s908_s19 = smov 96   ;;  %s1213_s0 = inlined_call_operand.vmem [shape: s32[64,1], index: 0, kind: input, shape index: {}]   ;;  %s1214_s2 = inlined_call_operand.vmem [shape: f32[24,96], index: 2, kind: input, shape index: {}]   ;;  %s1215_s4 = inlined_call_operand.vmem [shape: f32[1,32], index: 4, kind: input, shape index: {}]   ;;  %s1216_s3 = inlined_call_operand.vmem [shape: f32[32,96], index: 3, kind: input, shape index: {}]   ;;  %s1217_s1 = inlined_call_operand.vmem [shape: s32[8,1], index: 1, kind: input, shape index: {}]   ;;  %s1218_s5 = inlined_call_operand.vmem [shape: f32[8,8,32], index: 5, kind: output, shape index: {0}]   ;;  %s1219_s6 = inlined_call_operand.vmem [shape: f32[1,8,32], index: 6, kind: output, shape index: {1}]  }
   0x1   :  { %846 = vset.pattern.permute.xlu0 %v905_v0  ;;  %v26_v1 = vld [vmem:[%s1213_s0 + $0x20] sm:$0xff]  ;;  %v82_v2 = vld [vmem:[%s1214_s2 + $0x10] sm:$0xff]  ;;  %847 = vset.pattern.permute.xlu2 %v905_v0  ;;  %v81_v3 = vld [vmem:[%s1214_s2 + $0x8] sm:$0xff]  ;;  %vm159_vm11 = vcmask 261120   ;;  %v909_v59 = vmov 1  }
   0x2   :  { %45 = vperm.xlu0 %846, %v26_v1   ;;  %826 = vmatpush.msra.mxu1 %v82_v2  ;;  %v22_v4 = vld [vmem:[%s1213_s0] sm:$0xff]  ;;  %v972_v6 = vld [vmem:[%s1216_s3 + $0x18] sm:$0xff]  ;;  %v977_v7 = vld [vmem:[%s1216_s3 + $0x10] sm:$0xff]  ;;  %v1005_v12 = vand.u32 127, %v30_v11 }
   0x3   :  { %121 = vmatpush.msra.mxu0 %v82_v2  ;;  %848 = vset.pattern.permute.xlu1 %v905_v0  ;;  %v80_v5 = vld [vmem:[%s1214_s2] sm:$0xff]  ;;  %v984_v8 = vld [vmem:[%s1216_s3 + $0x8] sm:$0xff] }
   0x4   :  { %829 = vmatpush.msra.mxu1 %v81_v3  ;;  %827 = vmatpush.msra.mxu2 %v82_v2  ;;  %v995_v9 = vld [vmem:[%s1216_s3] sm:$0xff]  ;;  %v27_v40 = vld [vmem:[%s1213_s0 + $0x28] sm:$0xff] }
   0x5   :  { %122 = vmatpush.msra.mxu0 %v81_v3  ;;  %828 = vmatpush.msra.mxu3 %v82_v2  ;;  %v856_v10 = vld [vmem:[%s1215_s4] ss:$0 sm:$0xff]  ;;  %v23_v47 = vld [vmem:[%s1213_s0 + $0x8] sm:$0xff] }
   0x6   :  { %830 = vmatpush.msra.mxu2 %v81_v3  ;;  %832 = vmatpush.msra.mxu1 %v80_v5  ;;  %v154_v39 = vld [vmem:[%s1217_s1] sm:$0xff] }
   0x7   :  { %831 = vmatpush.msra.mxu3 %v81_v3  ;;  %123 = vmatpush.msra.mxu0 %v80_v5 }
   0x8   :  { %833 = vmatpush.msra.mxu2 %v80_v5  ;;  %175 = vmatpush.msrb.mxu1 %v972_v6 }
   0x9   :  { %834 = vmatpush.msra.mxu3 %v80_v5  ;;  %205 = vrot.lane.b32.xlu1 %v856_v10, %s906_s16 }
   0xa   :  { %33 = vperm.xlu0 %846, %v22_v4   ;;  %253 = vmatpush.msrb.mxu2 %v972_v6 }
   0xb   :  { %330 = vmatpush.msrb.mxu3 %v972_v6  ;;  %176 = vmatpush.msrb.mxu1 %v977_v7 }
   0xc   :  { %254 = vmatpush.msrb.mxu2 %v977_v7 }
   0xd   :  { %331 = vmatpush.msrb.mxu3 %v977_v7  ;;  %177 = vmatpush.msrb.mxu1 %v984_v8 }
   0xe   :  { %255 = vmatpush.msrb.mxu2 %v984_v8 }
   0xf   :  { %332 = vmatpush.msrb.mxu3 %v984_v8  ;;  %178 = vmatpush.msrb.mxu1 %v995_v9 }
  0x10   :  { %256 = vmatpush.msrb.mxu2 %v995_v9 }
  0x11   :  { %333 = vmatpush.msrb.mxu3 %v995_v9 }
  0x74   :  { %v46_v13 = vpop.permute.xlu0 %45 }
  0x75   :  { %vm60_vm1 = vcmp.eq.s32.totalorder %v46_v13, %v1005_v12 }
  0x76   :  { %v792_v15 = vsel %vm60_vm1, 1.0, %v907_v14 }
  0x77   :  { %800 = vmatmul.msk.f32.vlgmr.msra.gmra.mxu1 %vm83_vm0, %v792_v15 }
  0x78   :  { %407 = vmatpush.msra.mxu1 %v972_v6 }
  0x7a   :  { %408 = vmatpush.msra.mxu1 %v977_v7 }
  0x7b   :  { %v1024_v19 = vpop.permute.xlu1 %205 }
  0x7c   :  { %v34_v16 = vpop.permute.xlu0 %33  ;;  %409 = vmatpush.msra.mxu1 %v984_v8 }
  0x7d   :  { %vm56_vm2 = vcmp.eq.s32.totalorder %v34_v16, %v1005_v12 }
  0x7e   :  { %v788_v17 = vsel %vm56_vm2, 1.0, %v907_v14  ;;  %410 = vmatpush.msra.mxu1 %v995_v9 }
  0x7f   :  { %796 = vmatmul.msk.f32.vlgmr.msra.gmra.mxu0 %vm83_vm0, %v788_v17  ;;  %179 = vmatmul.f32.vlgmr.msrb.gmra.mxu1 %v907_v14 }
  0x80   :  { %638 = vmatpush.msrb.mxu1 %v972_v6 }
  0x82   :  { %639 = vmatpush.msrb.mxu1 %v977_v7 }
  0x84   :  { %640 = vmatpush.msrb.mxu1 %v984_v8 }
  0x86   :  { %641 = vmatpush.msrb.mxu1 %v995_v9 }
  0xf4   :  { %v1022_v18 = vpop.f32.mrf.mxu1 }
  0xfc   :  { %v180_v20 = vpop.f32.mrf.mxu1  ;;  %v125_v22 = vpop.f32.mrf.mxu0 }
  0xfd   :  { %v208_v21 = vadd.f32 %v1024_v19, %v180_v20  ;;  %v183_v23 = vadd.f32 %v180_v20, %v125_v22 }
  0xff   :  { %210 = vrot.lane.b32.xlu1 %v208_v21, %s906_s16  ;;  %v804_v24 = vmul.f32 -1.442695, %v183_v23 }
 0x101   :  { %857 = vpow2.f32 %v804_v24  ;;  %v28_v24 = vld [vmem:[%s1213_s0 + $0x30] sm:$0xff] }
 0x107   :  { %v858_v25 = vpop.eup %857 }
 0x108   :  { %v187_v26 = vadd.f32 1.0, %v858_v25  ;;  %v24_v25 = vld [vmem:[%s1213_s0 + $0x10] sm:$0xff] }
 0x10a   :  { %859 = vrcp.f32 %v187_v26  ;;  %v199_v32 = vand.u32 2147483648, %v187_v26  ;;  %vm193_vm4 = vweird.f32 %v187_v26  ;;  %v197_v33 = vand.u32 2147483647, %v187_v26 }
 0x10c   :  { %v200_v35 = vor.u32 1.1754944e-38, %v199_v32  ;;  %vm198_vm6 = vcmp.eq.f32.partialorder %v197_v33, 8.507059e+37 }
 0x110   :  { %v860_v27 = vpop.eup %859 }
 0x111   :  { %v189_v28 = vmul.f32 %v860_v27, %v187_v26  ;;  %vm194_vm3 = vweird.f32 %v860_v27 }
 0x112   :  { %vm195_vm5 = vmor %vm193_vm4, %vm194_vm3 }
 0x113   :  { %v190_v29 = vsub.f32 1.0, %v189_v28 }
 0x115   :  { %v191_v30 = vmul.f32 %v860_v27, %v190_v29 }
 0x117   :  { %v192_v31 = vadd.f32 %v860_v27, %v191_v30 }
 0x119   :  { %v196_v34 = vsel %vm195_vm5, %v860_v27, %v192_v31  ;;  %v29_v31 = vld [vmem:[%s1213_s0 + $0x38] sm:$0xff] }
 0x11a   :  { %v201_v37 = vsel %vm198_vm6, %v200_v35, %v196_v34 }
 0x11b   :  { %v220_v49 = vsub.f32 1.0, %v201_v37  ;;  %v226_v51 = vmul.f32 0.0, %v201_v37 }
 0x171   :  { %v211_v36 = vpop.permute.xlu1 %210 }
 0x172   :  { %v213_v38 = vmul.f32 %v211_v36, %v201_v37 }
 0x174   :  { %215 = vrot.lane.b32.xlu2 %v213_v38, %s906_s16 }
 0x17c   :  { %156 = vperm.xlu2 %847, %v154_v39  }
 0x184   :  { %48 = vperm.xlu2 %847, %v27_v40  }
 0x18c   :  { %849 = vset.pattern.permute.xlu2 %v909_v59 }
 0x1ce   :  { %v216_v41 = vpop.permute.xlu2 %215 }
 0x1cf   :  { %v218_v42 = vadd.f32 %v216_v41, %v125_v22  ;;  %v910_v41 = vmov 2  }
 0x1d1   :  { %861 = vtanh.f32 %v218_v42 }
 0x1d6   :  { %v157_v43 = vpop.permute.xlu2 %156 }
 0x1d7   :  { %v862_v44 = vpop.eup %861  ;;  %vm158_vm7 = vcmp.lt.s32.totalorder %v1005_v12, %v157_v43 }
 0x1d8   :  { %v1037_v45 = vsel %vm158_vm7, 1, %v905_v0  ;;  %222 = vrot.lane.b32.xlu0 %v862_v44, %s908_s19 }
 0x1d9   :  { %230 = vperm.xlu1 %848, %v1037_v45  }
 0x1de   :  { %v49_v46 = vpop.permute.xlu2 %48 }
 0x1df   :  { %vm61_vm8 = vcmp.eq.s32.totalorder %v49_v46, %v1005_v12 }
 0x1e0   :  { %v793_v48 = vsel %vm61_vm8, 1.0, %v907_v14 }
 0x1e1   :  { %36 = vperm.xlu1 %848, %v23_v47   ;;  %801 = vmatmul.msk.f32.vlgmr.msra.gmra.mxu2 %vm83_vm0, %v793_v48 }
 0x1e2   :  { %484 = vmatpush.msra.mxu2 %v972_v6 }
 0x1e4   :  { %485 = vmatpush.msra.mxu2 %v977_v7 }
 0x1e6   :  { %486 = vmatpush.msra.mxu2 %v984_v8 }
 0x1e8   :  { %487 = vmatpush.msra.mxu2 %v995_v9 }
 0x24a   :  { %v223_v50 = vpop.permute.xlu0 %222 }
 0x24b   :  { %v225_v52 = vmul.f32 %v223_v50, %v220_v49  ;;  %v231_v53 = vpop.permute.xlu1 %230 }
 0x24c   :  { %vm232_vm9 = vcmp.eq.s32.totalorder %v231_v53, 1 }
 0x24d   :  { %v227_v54 = vadd.f32 %v226_v51, %v225_v52 }
 0x24f   :  { %v1051_v55 = vsel %vm232_vm9, %v227_v54, 0.0 }
 0x250   :  { %235 = vrot.lane.b32.xlu0 %v1051_v55, %s908_s19 }
 0x253   :  { %v37_v56 = vpop.permute.xlu1 %36 }
 0x254   :  { %vm57_vm10 = vcmp.eq.s32.totalorder %v37_v56, %v1005_v12 }
 0x255   :  { %v789_v57 = vsel %vm57_vm10, 1.0, %v907_v14 }
 0x256   :  { %797 = vmatmul.msk.f32.gmra.mxu0 %vm83_vm0, %v789_v57 }
 0x264   :  { %v1067_v60 = vpop.f32.mrf.mxu2 }
 0x2c2   :  { %v236_v58 = vpop.permute.xlu0 %235 }
 0x2c3   :  { %238 = vst.msk [vmem:[%s1218_s5] sm:$0xff] %vm159_vm11, %v236_v58  ;;  %805 = vmatmul.msk.f32.vlgmr.msrb.gmra.mxu2 %vm159_vm11, %v236_v58 }
 0x2c4   :  { %715 = vmatpush.msrb.mxu2 %v972_v6 }
 0x2c6   :  { %716 = vmatpush.msrb.mxu2 %v977_v7 }
 0x2c8   :  { %717 = vmatpush.msrb.mxu2 %v984_v8 }
 0x2ca   :  { %718 = vmatpush.msrb.mxu2 %v995_v9 }
 0x2d3   :  { %v128_v63 = vpop.f32.mrf.mxu0 }
 0x346   :  { %v258_v61 = vpop.f32.mrf.mxu2 }
 0x347   :  { %v281_v62 = vadd.f32 %v258_v61, %v1024_v19  ;;  %v261_v0 = vadd.f32 %v258_v61, %v128_v63 }
 0x349   :  { %283 = vrot.lane.b32.xlu2 %v281_v62, %s906_s16  ;;  %v806_v1 = vmul.f32 -1.442695, %v261_v0 }
 0x34b   :  { %863 = vpow2.f32 %v806_v1 }
 0x351   :  { %302 = vperm.xlu2 %849, %v1037_v45   ;;  %v864_v2 = vpop.eup %863 }
 0x352   :  { %v265_v3 = vadd.f32 1.0, %v864_v2 }
 0x354   :  { %865 = vrcp.f32 %v265_v3  ;;  %v277_v15 = vand.u32 2147483648, %v265_v3  ;;  %vm271_vm13 = vweird.f32 %v265_v3  ;;  %v275_v16 = vand.u32 2147483647, %v265_v3 }
 0x356   :  { %v278_v20 = vor.u32 1.1754944e-38, %v277_v15  ;;  %vm276_vm15 = vcmp.eq.f32.partialorder %v275_v16, 8.507059e+37 }
 0x35a   :  { %v866_v4 = vpop.eup %865 }
 0x35b   :  { %v267_v5 = vmul.f32 %v866_v4, %v265_v3  ;;  %vm272_vm12 = vweird.f32 %v866_v4 }
 0x35c   :  { %vm273_vm14 = vmor %vm271_vm13, %vm272_vm12 }
 0x35d   :  { %v268_v10 = vsub.f32 1.0, %v267_v5 }
 0x35f   :  { %v269_v11 = vmul.f32 %v866_v4, %v268_v10 }
 0x361   :  { %v270_v13 = vadd.f32 %v866_v4, %v269_v11 }
 0x363   :  { %v274_v17 = vsel %vm273_vm14, %v866_v4, %v270_v13  ;;  %v25_v4 = vld [vmem:[%s1213_s0 + $0x18] sm:$0xff] }
 0x364   :  { %v279_v22 = vsel %vm276_vm15, %v278_v20, %v274_v17 }
 0x365   :  { %v293_v34 = vsub.f32 1.0, %v279_v22 }
 0x3a3   :  { %v284_v21 = vpop.permute.xlu2 %283 }
 0x3a4   :  { %v286_v23 = vmul.f32 %v284_v21, %v279_v22 }
 0x3a6   :  { %288 = vrot.lane.b32.xlu0 %v286_v23, %s906_s16 }
 0x3ab   :  { %v303_v35 = vpop.permute.xlu2 %302 }
 0x3ac   :  { %vm304_vm3 = vcmp.eq.s32.totalorder %v303_v35, 1 }
 0x3ae   :  { %51 = vperm.xlu0 %846, %v28_v24   ;;  %v911_v24 = vmov 3  }
 0x3b6   :  { %39 = vperm.xlu0 %846, %v24_v25  }
 0x418   :  { %v289_v26 = vpop.permute.xlu0 %288 }
 0x419   :  { %v291_v27 = vadd.f32 %v289_v26, %v128_v63 }
 0x41b   :  { %867 = vtanh.f32 %v291_v27 }
 0x420   :  { %v52_v28 = vpop.permute.xlu0 %51 }
 0x421   :  { %v868_v29 = vpop.eup %867  ;;  %vm62_vm1 = vcmp.eq.s32.totalorder %v52_v28, %v1005_v12 }
 0x422   :  { %v794_v30 = vsel %vm62_vm1, 1.0, %v907_v14  ;;  %295 = vrot.lane.b32.xlu1 %v868_v29, %s908_s19 }
 0x423   :  { %802 = vmatmul.msk.f32.vlgmr.msra.gmra.mxu3 %vm83_vm0, %v794_v30 }
 0x424   :  { %561 = vmatpush.msra.mxu3 %v972_v6 }
 0x426   :  { %562 = vmatpush.msra.mxu3 %v977_v7  ;;  %v299_v7 = vmul.f32 %v279_v22, %v1051_v55 }
 0x428   :  { %v40_v32 = vpop.permute.xlu0 %39  ;;  %563 = vmatpush.msra.mxu3 %v984_v8 }
 0x429   :  { %vm58_vm2 = vcmp.eq.s32.totalorder %v40_v32, %v1005_v12 }
 0x42a   :  { %v790_v33 = vsel %vm58_vm2, 1.0, %v907_v14  ;;  %54 = vperm.xlu1 %848, %v29_v31   ;;  %564 = vmatpush.msra.mxu3 %v995_v9 }
 0x42b   :  { %798 = vmatmul.msk.f32.gmra.mxu0 %vm83_vm0, %v790_v33 }
 0x432   :  { %850 = vset.pattern.permute.xlu1 %v910_v41 }
 0x494   :  { %v296_v6 = vpop.permute.xlu1 %295 }
 0x495   :  { %v298_v36 = vmul.f32 %v296_v6, %v293_v34 }
 0x497   :  { %v300_v37 = vadd.f32 %v299_v7, %v298_v36 }
 0x499   :  { %v305_v38 = vsel %vm304_vm3, %v300_v37, %v1051_v55  ;;  %v1095_v8 = vsel %vm304_vm3, %v300_v37, 0.0 }
 0x49a   :  { %314 = vrot.lane.b32.xlu2 %v305_v38, %s908_s19 }
 0x49c   :  { %v55_v39 = vpop.permute.xlu1 %54 }
 0x49d   :  { %vm63_vm4 = vcmp.eq.s32.totalorder %v55_v39, %v1005_v12 }
 0x49e   :  { %v795_v9 = vsel %vm63_vm4, 1.0, %v907_v14 }
 0x49f   :  { %803 = vmatmul.msk.f32.gmra.mxu3 %vm83_vm0, %v795_v9 }
 0x4a6   :  { %v1102_v42 = vpop.f32.mrf.mxu3 }
 0x4a8   :  { %v131_v47 = vpop.f32.mrf.mxu0 }
 0x4f4   :  { %v315_v40 = vpop.permute.xlu2 %314 }
 0x4f5   :  { %808 = vmatmul.msk.f32.vlgmr.msrb.gmra.mxu3 %vm159_vm11, %v315_v40 }
 0x522   :  { %v1104_v43 = vpop.f32.mrf.mxu3 }
 0x578   :  { %v335_v44 = vpop.f32.mrf.mxu3 }
 0x579   :  { %v358_v46 = vadd.f32 %v335_v44, %v1024_v19  ;;  %v338_v48 = vadd.f32 %v335_v44, %v131_v47 }
 0x57b   :  { %360 = vrot.lane.b32.xlu1 %v358_v46, %s906_s16  ;;  %v809_v49 = vmul.f32 -1.442695, %v338_v48 }
 0x57d   :  { %869 = vpow2.f32 %v809_v49 }
 0x583   :  { %379 = vperm.xlu1 %850, %v1037_v45   ;;  %v870_v50 = vpop.eup %869 }
 0x584   :  { %v342_v51 = vadd.f32 1.0, %v870_v50 }
 0x586   :  { %871 = vrcp.f32 %v342_v51  ;;  %v354_v57 = vand.u32 2147483648, %v342_v51  ;;  %vm348_vm6 = vweird.f32 %v342_v51  ;;  %v352_v58 = vand.u32 2147483647, %v342_v51 }
 0x588   :  { %v355_v61 = vor.u32 1.1754944e-38, %v354_v57  ;;  %vm353_vm8 = vcmp.eq.f32.partialorder %v352_v58, 8.507059e+37  ;;  %v913_v57 = vmov 5   ;;  %v914_v58 = vmov 6  }
 0x58b   :  { %851 = vset.pattern.permute.xlu1 %v911_v24 }
 0x58c   :  { %v872_v52 = vpop.eup %871 }
 0x58d   :  { %v344_v53 = vmul.f32 %v872_v52, %v342_v51  ;;  %vm349_vm5 = vweird.f32 %v872_v52 }
 0x58e   :  { %vm350_vm7 = vmor %vm348_vm6, %vm349_vm5 }
 0x58f   :  { %v345_v54 = vsub.f32 1.0, %v344_v53 }
 0x591   :  { %v346_v55 = vmul.f32 %v872_v52, %v345_v54  ;;  %v912_v54 = vmov 4  }
 0x593   :  { %v347_v56 = vadd.f32 %v872_v52, %v346_v55 }
 0x595   :  { %v351_v59 = vsel %vm350_vm7, %v872_v52, %v347_v56 }
 0x596   :  { %v356_v63 = vsel %vm353_vm8, %v355_v61, %v351_v59  ;;  %v915_v59 = vmov 7  }
 0x597   :  { %v370_v5 = vsub.f32 1.0, %v356_v63  ;;  %v376_v13 = vmul.f32 %v356_v63, %v305_v38 }
 0x5ed   :  { %v361_v62 = vpop.permute.xlu1 %360 }
 0x5ee   :  { %v363_v0 = vmul.f32 %v361_v62, %v356_v63 }
 0x5f0   :  { %365 = vrot.lane.b32.xlu2 %v363_v0, %s906_s16 }
 0x5f5   :  { %v380_v11 = vpop.permute.xlu1 %379 }
 0x5f6   :  { %vm381_vm9 = vcmp.eq.s32.totalorder %v380_v11, 1 }
 0x64a   :  { %v366_v1 = vpop.permute.xlu2 %365 }
 0x64b   :  { %v368_v2 = vadd.f32 %v366_v1, %v131_v47 }
 0x64d   :  { %873 = vtanh.f32 %v368_v2 }
 0x653   :  { %v874_v3 = vpop.eup %873 }
 0x654   :  { %372 = vrot.lane.b32.xlu0 %v874_v3, %s908_s19 }
 0x65c   :  { %42 = vperm.xlu0 %846, %v25_v4  }
 0x664   :  { %852 = vset.pattern.permute.xlu0 %v912_v54 }
 0x6c6   :  { %v373_v10 = vpop.permute.xlu0 %372 }
 0x6c7   :  { %v375_v15 = vmul.f32 %v373_v10, %v370_v5 }
 0x6c9   :  { %v377_v16 = vadd.f32 %v376_v13, %v375_v15 }
 0x6cb   :  { %v382_v17 = vsel %vm381_vm9, %v377_v16, %v305_v38  ;;  %v1114_v20 = vsel %vm381_vm9, %v377_v16, 0.0 }
 0x6cc   :  { %391 = vrot.lane.b32.xlu2 %v382_v17, %s908_s19 }
 0x6ce   :  { %v43_v21 = vpop.permute.xlu0 %42 }
 0x6cf   :  { %vm59_vm10 = vcmp.eq.s32.totalorder %v43_v21, %v1005_v12 }
 0x6d0   :  { %v791_v22 = vsel %vm59_vm10, 1.0, %v907_v14 }
 0x6d1   :  { %799 = vmatmul.msk.f32.gmra.mxu0 %vm83_vm0, %v791_v22 }
 0x726   :  { %v392_v23 = vpop.permute.xlu2 %391 }
 0x727   :  { %811 = vmatmul.msk.f32.vlgmr.msra.gmra.mxu1 %vm159_vm11, %v392_v23 }
 0x74e   :  { %v134_v27 = vpop.f32.mrf.mxu0 }
 0x7a4   :  { %v412_v25 = vpop.f32.mrf.mxu1 }
 0x7a5   :  { %v435_v26 = vadd.f32 %v412_v25, %v1024_v19  ;;  %v415_v28 = vadd.f32 %v412_v25, %v134_v27 }
 0x7a7   :  { %437 = vrot.lane.b32.xlu1 %v435_v26, %s906_s16  ;;  %v812_v29 = vmul.f32 -1.442695, %v415_v28 }
 0x7a9   :  { %875 = vpow2.f32 %v812_v29 }
 0x7af   :  { %456 = vperm.xlu1 %851, %v1037_v45   ;;  %v876_v12 = vpop.eup %875 }
 0x7b0   :  { %v419_v14 = vadd.f32 1.0, %v876_v12 }
 0x7b2   :  { %877 = vrcp.f32 %v419_v14  ;;  %v431_v6 = vand.u32 2147483648, %v419_v14  ;;  %vm425_vm12 = vweird.f32 %v419_v14  ;;  %v429_v35 = vand.u32 2147483647, %v419_v14 }
 0x7b4   :  { %v432_v36 = vor.u32 1.1754944e-38, %v431_v6  ;;  %vm430_vm14 = vcmp.eq.f32.partialorder %v429_v35, 8.507059e+37 }
 0x7b8   :  { %v878_v30 = vpop.eup %877 }
 0x7b9   :  { %v421_v31 = vmul.f32 %v878_v30, %v419_v14  ;;  %vm426_vm0 = vweird.f32 %v878_v30 }
 0x7ba   :  { %vm427_vm13 = vmor %vm425_vm12, %vm426_vm0 }
 0x7bb   :  { %v422_v32 = vsub.f32 1.0, %v421_v31 }
 0x7bd   :  { %v423_v33 = vmul.f32 %v878_v30, %v422_v32 }
 0x7bf   :  { %v424_v34 = vadd.f32 %v878_v30, %v423_v33 }
 0x7c1   :  { %v428_v7 = vsel %vm427_vm13, %v878_v30, %v424_v34 }
 0x7c2   :  { %v433_v38 = vsel %vm430_vm14, %v432_v36, %v428_v7 }
 0x7c3   :  { %v447_v44 = vsub.f32 1.0, %v433_v38  ;;  %v453_v48 = vmul.f32 %v433_v38, %v382_v17 }
 0x819   :  { %v438_v37 = vpop.permute.xlu1 %437 }
 0x81a   :  { %v440_v39 = vmul.f32 %v438_v37, %v433_v38 }
 0x81c   :  { %442 = vrot.lane.b32.xlu2 %v440_v39, %s906_s16 }
 0x821   :  { %v457_v47 = vpop.permute.xlu1 %456 }
 0x822   :  { %vm458_vm15 = vcmp.eq.s32.totalorder %v457_v47, 1 }
 0x876   :  { %v443_v9 = vpop.permute.xlu2 %442 }
 0x877   :  { %v445_v40 = vadd.f32 %v443_v9, %v134_v27 }
 0x879   :  { %879 = vtanh.f32 %v445_v40 }
 0x87f   :  { %v880_v41 = vpop.eup %879 }
 0x880   :  { %449 = vrot.lane.b32.xlu0 %v880_v41, %s908_s19 }
 0x8f2   :  { %v450_v46 = vpop.permute.xlu0 %449 }
 0x8f3   :  { %v452_v49 = vmul.f32 %v450_v46, %v447_v44 }
 0x8f5   :  { %v454_v50 = vadd.f32 %v453_v48, %v452_v49 }
 0x8f7   :  { %v459_v51 = vsel %vm458_vm15, %v454_v50, %v382_v17  ;;  %v1126_v52 = vsel %vm458_vm15, %v454_v50, 0.0 }
 0x8f8   :  { %468 = vrot.lane.b32.xlu2 %v459_v51, %s908_s19 }
 0x952   :  { %v469_v53 = vpop.permute.xlu2 %468 }
 0x953   :  { %814 = vmatmul.msk.f32.vlgmr.msra.gmra.mxu2 %vm159_vm11, %v469_v53 }
 0x9d6   :  { %v489_v55 = vpop.f32.mrf.mxu2 }
 0x9d7   :  { %v512_v56 = vadd.f32 %v489_v55, %v1024_v19  ;;  %v492_v61 = vadd.f32 %v489_v55, %v1022_v18 }
 0x9d9   :  { %514 = vrot.lane.b32.xlu0 %v512_v56, %s906_s16  ;;  %v815_v62 = vmul.f32 -1.442695, %v492_v61 }
 0x9db   :  { %881 = vpow2.f32 %v815_v62 }
 0x9e1   :  { %533 = vperm.xlu0 %852, %v1037_v45   ;;  %v882_v63 = vpop.eup %881 }
 0x9e2   :  { %v496_v0 = vadd.f32 1.0, %v882_v63 }
 0x9e4   :  { %883 = vrcp.f32 %v496_v0  ;;  %v508_v10 = vand.u32 2147483648, %v496_v0  ;;  %vm502_vm2 = vweird.f32 %v496_v0  ;;  %v506_v11 = vand.u32 2147483647, %v496_v0 }
 0x9e6   :  { %v509_v15 = vor.u32 1.1754944e-38, %v508_v10  ;;  %vm507_vm4 = vcmp.eq.f32.partialorder %v506_v11, 8.507059e+37 }
 0x9e9   :  { %853 = vset.pattern.permute.xlu0 %v913_v57 }
 0x9ea   :  { %610 = vperm.xlu0 %853, %v1037_v45   ;;  %v884_v1 = vpop.eup %883 }
 0x9eb   :  { %v498_v2 = vmul.f32 %v884_v1, %v496_v0  ;;  %vm503_vm1 = vweird.f32 %v884_v1 }
 0x9ec   :  { %vm504_vm3 = vmor %vm502_vm2, %vm503_vm1 }
 0x9ed   :  { %v499_v3 = vsub.f32 1.0, %v498_v2 }
 0x9ef   :  { %v500_v4 = vmul.f32 %v884_v1, %v499_v3 }
 0x9f1   :  { %v501_v5 = vadd.f32 %v884_v1, %v500_v4 }
 0x9f2   :  { %854 = vset.pattern.permute.xlu0 %v914_v58 }
 0x9f3   :  { %687 = vperm.xlu0 %854, %v1037_v45   ;;  %v505_v13 = vsel %vm504_vm3, %v884_v1, %v501_v5 }
 0x9f4   :  { %v510_v16 = vsel %vm507_vm4, %v509_v15, %v505_v13 }
 0x9f5   :  { %v524_v24 = vsub.f32 1.0, %v510_v16  ;;  %v530_v27 = vmul.f32 %v510_v16, %v459_v51 }
 0x9fb   :  { %855 = vset.pattern.permute.xlu0 %v915_v59 }
 0x9fc   :  { %764 = vperm.xlu0 %855, %v1037_v45  }
 0xa4b   :  { %v515_v45 = vpop.permute.xlu0 %514 }
 0xa4c   :  { %v517_v17 = vmul.f32 %v515_v45, %v510_v16 }
 0xa4e   :  { %519 = vrot.lane.b32.xlu1 %v517_v17, %s906_s16 }
 0xa53   :  { %v534_v26 = vpop.permute.xlu0 %533 }
 0xa54   :  { %vm535_vm5 = vcmp.eq.s32.totalorder %v534_v26, 1 }
 0xa5c   :  { %v611_v54 = vpop.permute.xlu0 %610 }
 0xa5d   :  { %vm612_vm10 = vcmp.eq.s32.totalorder %v611_v54, 1 }
 0xa65   :  { %v688_v61 = vpop.permute.xlu0 %687 }
 0xa66   :  { %vm689_vm15 = vcmp.eq.s32.totalorder %v688_v61, 1 }
 0xa6e   :  { %v1152_v62 = vpop.permute.xlu0 %764 }
 0xac0   :  { %v520_v21 = vpop.permute.xlu1 %519 }
 0xac1   :  { %v522_v22 = vadd.f32 %v520_v21, %v1022_v18 }
 0xac3   :  { %885 = vtanh.f32 %v522_v22 }
 0xac9   :  { %v886_v23 = vpop.eup %885 }
 0xaca   :  { %526 = vrot.lane.b32.xlu2 %v886_v23, %s908_s19 }
 0xb24   :  { %v527_v25 = vpop.permute.xlu2 %526 }
 0xb25   :  { %v529_v28 = vmul.f32 %v527_v25, %v524_v24 }
 0xb27   :  { %v531_v29 = vadd.f32 %v530_v27, %v529_v28 }
 0xb29   :  { %v536_v12 = vsel %vm535_vm5, %v531_v29, %v459_v51  ;;  %v1140_v14 = vsel %vm535_vm5, %v531_v29, 0.0  ;;  %vm766_vm5 = vcmp.eq.s32.totalorder %v1152_v62, 1 }
 0xb2a   :  { %545 = vrot.lane.b32.xlu1 %v536_v12, %s908_s19 }
 0xb9c   :  { %v546_v30 = vpop.permute.xlu1 %545 }
 0xb9d   :  { %817 = vmatmul.msk.f32.vlgmr.msra.gmra.mxu3 %vm159_vm11, %v546_v30 }
 0xc20   :  { %v566_v18 = vpop.f32.mrf.mxu3 }
 0xc21   :  { %v589_v31 = vadd.f32 %v566_v18, %v1024_v19  ;;  %v569_v32 = vadd.f32 %v566_v18, %v1067_v60 }
 0xc23   :  { %591 = vrot.lane.b32.xlu2 %v589_v31, %s906_s16  ;;  %v818_v33 = vmul.f32 -1.442695, %v569_v32 }
 0xc25   :  { %887 = vpow2.f32 %v818_v33 }
 0xc2b   :  { %v888_v34 = vpop.eup %887 }
 0xc2c   :  { %v573_v6 = vadd.f32 1.0, %v888_v34 }
 0xc2e   :  { %889 = vrcp.f32 %v573_v6  ;;  %v585_v39 = vand.u32 2147483648, %v573_v6  ;;  %vm579_vm7 = vweird.f32 %v573_v6  ;;  %v583_v9 = vand.u32 2147483647, %v573_v6 }
 0xc30   :  { %v586_v41 = vor.u32 1.1754944e-38, %v585_v39  ;;  %vm584_vm9 = vcmp.eq.f32.partialorder %v583_v9, 8.507059e+37 }
 0xc34   :  { %v890_v35 = vpop.eup %889 }
 0xc35   :  { %v575_v7 = vmul.f32 %v890_v35, %v573_v6  ;;  %vm580_vm6 = vweird.f32 %v890_v35 }
 0xc36   :  { %vm581_vm8 = vmor %vm579_vm7, %vm580_vm6 }
 0xc37   :  { %v576_v36 = vsub.f32 1.0, %v575_v7 }
 0xc39   :  { %v577_v37 = vmul.f32 %v890_v35, %v576_v36 }
 0xc3b   :  { %v578_v38 = vadd.f32 %v890_v35, %v577_v37 }
 0xc3d   :  { %v582_v40 = vsel %vm581_vm8, %v890_v35, %v578_v38 }
 0xc3e   :  { %v587_v46 = vsel %vm584_vm9, %v586_v41, %v582_v40 }
 0xc3f   :  { %v601_v51 = vsub.f32 1.0, %v587_v46  ;;  %v607_v55 = vmul.f32 %v587_v46, %v536_v12 }
 0xc7d   :  { %v592_v44 = vpop.permute.xlu2 %591 }
 0xc7e   :  { %v594_v47 = vmul.f32 %v592_v44, %v587_v46 }
 0xc80   :  { %596 = vrot.lane.b32.xlu1 %v594_v47, %s906_s16 }
 0xcf2   :  { %v597_v48 = vpop.permute.xlu1 %596 }
 0xcf3   :  { %v599_v49 = vadd.f32 %v597_v48, %v1067_v60 }
 0xcf5   :  { %891 = vtanh.f32 %v599_v49 }
 0xcfb   :  { %v892_v50 = vpop.eup %891 }
 0xcfc   :  { %603 = vrot.lane.b32.xlu2 %v892_v50, %s908_s19 }
 0xd56   :  { %v604_v53 = vpop.permute.xlu2 %603 }
 0xd57   :  { %v606_v56 = vmul.f32 %v604_v53, %v601_v51 }
 0xd59   :  { %v608_v57 = vadd.f32 %v607_v55, %v606_v56 }
 0xd5b   :  { %v614_v58 = vsel %vm612_vm10, %v608_v57, 0.0  ;;  %v613_v59 = vsel %vm612_vm10, %v608_v57, %v536_v12 }
 0xd5c   :  { %616 = vrot.lane.b32.xlu0 %v614_v58, %s908_s19  ;;  %622 = vrot.lane.b32.xlu1 %v613_v59, %s908_s19 }
 0xdce   :  { %v617_v60 = vpop.permute.xlu0 %616  ;;  %v623_v63 = vpop.permute.xlu1 %622 }
 0xdcf   :  { %819 = vst.msk [vmem:[%s1218_s5 + $0x28] sm:$0xff] %vm159_vm11, %v617_v60  ;;  %820 = vmatmul.msk.f32.vlgmr.msrb.gmra.mxu1 %vm159_vm11, %v623_v63 }
 0xe4c   :  { %v643_v0 = vpop.f32.mrf.mxu1 }
 0xe4d   :  { %v666_v1 = vadd.f32 %v643_v0, %v1024_v19  ;;  %v646_v2 = vadd.f32 %v643_v0, %v1102_v42 }
 0xe4f   :  { %668 = vrot.lane.b32.xlu2 %v666_v1, %s906_s16  ;;  %v821_v3 = vmul.f32 -1.442695, %v646_v2 }
 0xe51   :  { %893 = vpow2.f32 %v821_v3 }
 0xe57   :  { %v894_v4 = vpop.eup %893 }
 0xe58   :  { %v650_v5 = vadd.f32 1.0, %v894_v4 }
 0xe5a   :  { %895 = vrcp.f32 %v650_v5  ;;  %v662_v16 = vand.u32 2147483648, %v650_v5  ;;  %vm656_vm12 = vweird.f32 %v650_v5  ;;  %v660_v17 = vand.u32 2147483647, %v650_v5 }
 0xe5c   :  { %v663_v22 = vor.u32 1.1754944e-38, %v662_v16  ;;  %vm661_vm14 = vcmp.eq.f32.partialorder %v660_v17, 8.507059e+37 }
 0xe60   :  { %v896_v10 = vpop.eup %895 }
 0xe61   :  { %v652_v11 = vmul.f32 %v896_v10, %v650_v5  ;;  %vm657_vm0 = vweird.f32 %v896_v10 }
 0xe62   :  { %vm658_vm13 = vmor %vm656_vm12, %vm657_vm0 }
 0xe63   :  { %v653_v13 = vsub.f32 1.0, %v652_v11 }
 0xe65   :  { %v654_v15 = vmul.f32 %v896_v10, %v653_v13 }
 0xe67   :  { %v655_v45 = vadd.f32 %v896_v10, %v654_v15 }
 0xe69   :  { %v659_v21 = vsel %vm658_vm13, %v896_v10, %v655_v45 }
 0xe6a   :  { %v664_v24 = vsel %vm661_vm14, %v663_v22, %v659_v21 }
 0xe6b   :  { %v678_v29 = vsub.f32 1.0, %v664_v24  ;;  %v684_v30 = vmul.f32 %v664_v24, %v613_v59 }
 0xea9   :  { %v669_v23 = vpop.permute.xlu2 %668 }
 0xeaa   :  { %v671_v25 = vmul.f32 %v669_v23, %v664_v24 }
 0xeac   :  { %673 = vrot.lane.b32.xlu1 %v671_v25, %s906_s16 }
 0xf1e   :  { %v674_v26 = vpop.permute.xlu1 %673 }
 0xf1f   :  { %v676_v27 = vadd.f32 %v674_v26, %v1102_v42 }
 0xf21   :  { %897 = vtanh.f32 %v676_v27 }
 0xf27   :  { %v898_v28 = vpop.eup %897 }
 0xf28   :  { %680 = vrot.lane.b32.xlu2 %v898_v28, %s908_s19 }
 0xf82   :  { %v681_v12 = vpop.permute.xlu2 %680 }
 0xf83   :  { %v683_v18 = vmul.f32 %v681_v12, %v678_v29 }
 0xf85   :  { %v685_v31 = vadd.f32 %v684_v30, %v683_v18 }
 0xf87   :  { %v690_v32 = vsel %vm689_vm15, %v685_v31, %v613_v59  ;;  %v691_v33 = vsel %vm689_vm15, %v685_v31, 0.0 }
 0xf88   :  { %699 = vrot.lane.b32.xlu1 %v690_v32, %s908_s19 }
 0xffa   :  { %v700_v34 = vpop.permute.xlu1 %699 }
 0xffb   :  { %823 = vmatmul.msk.f32.vlgmr.msrb.gmra.mxu2 %vm159_vm11, %v700_v34 }
0x107e   :  { %v720_v6 = vpop.f32.mrf.mxu2 }
0x107f   :  { %v743_v42 = vadd.f32 %v720_v6, %v1024_v19  ;;  %v723_v35 = vadd.f32 %v720_v6, %v1104_v43 }
0x1081   :  { %745 = vrot.lane.b32.xlu2 %v743_v42, %s906_s16  ;;  %v824_v7 = vmul.f32 -1.442695, %v723_v35 }
0x1083   :  { %899 = vpow2.f32 %v824_v7 }
0x1089   :  { %v900_v36 = vpop.eup %899 }
0x108a   :  { %v727_v37 = vadd.f32 1.0, %v900_v36 }
0x108c   :  { %901 = vrcp.f32 %v727_v37  ;;  %v739_v44 = vand.u32 2147483648, %v727_v37  ;;  %vm733_vm2 = vweird.f32 %v727_v37  ;;  %v737_v46 = vand.u32 2147483647, %v727_v37 }
0x108e   :  { %v740_v47 = vor.u32 1.1754944e-38, %v739_v44  ;;  %vm738_vm4 = vcmp.eq.f32.partialorder %v737_v46, 8.507059e+37 }
0x1092   :  { %v902_v38 = vpop.eup %901 }
0x1093   :  { %v729_v39 = vmul.f32 %v902_v38, %v727_v37  ;;  %vm734_vm1 = vweird.f32 %v902_v38 }
0x1094   :  { %vm735_vm3 = vmor %vm733_vm2, %vm734_vm1 }
0x1095   :  { %v730_v9 = vsub.f32 1.0, %v729_v39 }
0x1097   :  { %v731_v40 = vmul.f32 %v902_v38, %v730_v9 }
0x1099   :  { %v732_v41 = vadd.f32 %v902_v38, %v731_v40 }
0x109b   :  { %v736_v19 = vsel %vm735_vm3, %v902_v38, %v732_v41 }
0x109c   :  { %v741_v49 = vsel %vm738_vm4, %v740_v47, %v736_v19 }
0x109d   :  { %v761_v57 = vmul.f32 %v741_v49, %v690_v32 }
0x10db   :  { %v746_v48 = vpop.permute.xlu2 %745 }
0x10dc   :  { %v748_v50 = vmul.f32 %v746_v48, %v741_v49 }
0x10de   :  { %750 = vrot.lane.b32.xlu1 %v748_v50, %s906_s16 }
0x10e6   :  { %308 = vrot.lane.b32.xlu1 %v1095_v8, %s908_s19 }
0x10ee   :  { %462 = vrot.lane.b32.xlu1 %v1126_v52, %s908_s19 }
0x10f6   :  { %693 = vrot.lane.b32.xlu1 %v691_v33, %s908_s19 }
0x1150   :  { %v751_v51 = vpop.permute.xlu1 %750 }
0x1151   :  { %v753_v53 = vadd.f32 %v751_v51, %v1104_v43  ;;  %v755_v43 = vsub.f32 1.0, %v741_v49 }
0x1153   :  { %903 = vtanh.f32 %v753_v53 }
0x1158   :  { %v309_v54 = vpop.permute.xlu1 %308 }
0x1159   :  { %v904_v55 = vpop.eup %903  ;;  %807 = vst.msk [vmem:[%s1218_s5 + $0x8] sm:$0xff] %vm159_vm11, %v309_v54 }
0x115a   :  { %757 = vrot.lane.b32.xlu2 %v904_v55, %s908_s19 }
0x1160   :  { %v463_v56 = vpop.permute.xlu1 %462 }
0x1161   :  { %813 = vst.msk [vmem:[%s1218_s5 + $0x18] sm:$0xff] %vm159_vm11, %v463_v56 }
0x1162   :  { %385 = vrot.lane.b32.xlu2 %v1114_v20, %s908_s19 }
0x1168   :  { %v694_v8 = vpop.permute.xlu1 %693 }
0x1169   :  { %822 = vst.msk [vmem:[%s1218_s5 + $0x30] sm:$0xff] %vm159_vm11, %v694_v8 }
0x116a   :  { %539 = vrot.lane.b32.xlu2 %v1140_v14, %s908_s19 }
0x11b4   :  { %v758_v52 = vpop.permute.xlu2 %757 }
0x11b5   :  { %v760_v58 = vmul.f32 %v758_v52, %v755_v43 }
0x11b7   :  { %v762_v59 = vadd.f32 %v761_v57, %v760_v58 }
0x11b9   :  { %v768_v61 = vsel %vm766_vm5, %v762_v59, 0.0  ;;  %v767_v60 = vsel %vm766_vm5, %v762_v59, %v690_v32 }
0x11ba   :  { %770 = vrot.lane.b32.xlu2 %v768_v61, %s908_s19  ;;  %776 = vrot.lane.b32.xlu0 %v767_v60, %s908_s19 }
0x11bc   :  { %v386_v20 = vpop.permute.xlu2 %385 }
0x11bd   :  { %810 = vst.msk [vmem:[%s1218_s5 + $0x10] sm:$0xff] %vm159_vm11, %v386_v20 }
0x11c4   :  { %v540_v14 = vpop.permute.xlu2 %539 }
0x11c5   :  { %816 = vst.msk [vmem:[%s1218_s5 + $0x20] sm:$0xff] %vm159_vm11, %v540_v14 }
0x1214   :  { %v771_v63 = vpop.permute.xlu2 %770 }
0x1215   :  { %825 = vst.msk [vmem:[%s1218_s5 + $0x38] sm:$0xff] %vm159_vm11, %v771_v63 }
0x122c   :  { %v777_v62 = vpop.permute.xlu0 %776 }
0x122d   :  { %779 = vst.msk [vmem:[%s1219_s6] sm:$0xff] %vm159_vm11, %v777_v62 }

</bundles_post_ra>
